<compile_context>
chip_gen: v6e
topology: v6e:2x2x1
jax: 0.10.0
libtpu: 0.0.40
codegen_flags: <defaults>
</compile_context>

<pallas_src>
import functools

import jax
import jax.numpy as jnp
from jax import lax
from jax.experimental import pallas as pl
from jax.experimental.pallas import tpu as pltpu


def _entity_pooling_kernel(ents_ref, keep_ref, post_keep_ref,
                           w_in_ref, b_in_ref, w_out_ref, b_out_ref,
                           out_ref, *, pooling_type, inv_ne):
    blk, ne, in_dim = ents_ref.shape
    embed_dim = w_in_ref.shape[1]
    out_dim = w_out_ref.shape[1]

    x = ents_ref[...]                                        # (blk, ne, in_dim)

    # in_trans: Linear(in_dim -> embed_dim), batched over the batch block.
    w_in_b = jnp.broadcast_to(w_in_ref[...], (blk, in_dim, embed_dim))
    ents_trans = lax.dot_general(
        x, w_in_b, (((2,), (1,)), ((0,), (0,))),
        preferred_element_type=jnp.float32)                  # (blk, ne, embed)
    ents_trans = ents_trans + b_in_ref[...]                  # (1, embed) bcast

    keep = keep_ref[...]                                     # (blk, na, ne); 1.0 = visible

    if pooling_type == "mean":
        # masked_fill(pre_mask, 0).mean(dim=2) == (keep @ ents_trans) / ne.
        pooled = lax.dot_general(
            keep, ents_trans, (((2,), (1,)), ((0,), (0,))),
            preferred_element_type=jnp.float32) * inv_ne     # (blk, na, embed)
    elif pooling_type == "max":
        # keep in {0,1}  =>  keep * x == masked_fill(pre_mask, 0).  Running max
        # over the static entity axis; no 4-D intermediate.
        pooled = keep[:, :, 0:1] * ents_trans[:, 0:1, :]     # (blk, na, embed)
        for e in range(1, ne):
            pooled = jnp.maximum(
                pooled, keep[:, :, e:e + 1] * ents_trans[:, e:e + 1, :])
    else:
        raise ValueError(f"unknown pooling_type {pooling_type!r}")

    # out_trans: Linear(embed_dim -> out_dim), batched.
    w_out_b = jnp.broadcast_to(w_out_ref[...], (blk, embed_dim, out_dim))
    out = lax.dot_general(
        pooled, w_out_b, (((2,), (1,)), ((0,), (0,))),
        preferred_element_type=jnp.float32)                  # (blk, na, out_dim)
    out = out + b_out_ref[...]

    # post_mask: zero out unavailable agents. post_keep_ref is (blk, na, 1),
    # broadcast along the lane (out_dim) axis.
    out_ref[...] = (out * post_keep_ref[...]).astype(out_ref.dtype)


def entity_pooling_forward(entities, pre_mask, post_mask, params, pooling_type,
                           *, block_b=8):
    """entities: (bs, ne, in_dim) f32; pre_mask: (bs, >=na, ne) bool (True =
    masked out); post_mask: (bs, na) bool (True = masked out).
    Returns (bs, na, out_dim) float32."""
    if pooling_type not in ("mean", "max"):
        raise ValueError(f"unknown pooling_type {pooling_type!r}")

    w_in, b_in, w_out, b_out = params
    bs, ne, in_dim = entities.shape
    n_agents = post_mask.shape[1]
    embed_dim = w_in.shape[1]
    out_dim = w_out.shape[1]

    # Batch-block per grid step (amortizes per-step overhead; feeds the MXU with
    # batched matmuls).  Multiple of 8 for sublane alignment; capped so a tiny
    # batch is not over-padded.
    block_b = max(8, ((block_b + 7) // 8) * 8)
    block_b = min(block_b, ((bs + 7) // 8) * 8)
    bs_p = ((bs + block_b - 1) // block_b) * block_b
    pad = bs_p - bs

    ents = entities.astype(jnp.float32)
    keep_pre = 1.0 - pre_mask[:, :n_agents].astype(jnp.float32)     # (bs, na, ne)
    keep_post = (1.0 - post_mask.astype(jnp.float32))[:, :, None]   # (bs, na, 1)

    if pad:
        # Padded batches: fully masked -> their outputs are zero and sliced off.
        ents = jnp.pad(ents, ((0, pad), (0, 0), (0, 0)))
        keep_pre = jnp.pad(keep_pre, ((0, pad), (0, 0), (0, 0)))
        keep_post = jnp.pad(keep_post, ((0, pad), (0, 0), (0, 0)))

    b_in_2d = b_in.reshape(1, embed_dim).astype(jnp.float32)
    b_out_2d = b_out.reshape(1, out_dim).astype(jnp.float32)

    kernel = functools.partial(_entity_pooling_kernel,
                               pooling_type=pooling_type,
                               inv_ne=1.0 / ne)

    out = pl.pallas_call(
        kernel,
        out_shape=jax.ShapeDtypeStruct((bs_p, n_agents, out_dim), jnp.float32),
        grid=(bs_p // block_b,),
        in_specs=[
            pl.BlockSpec((block_b, ne, in_dim), lambda b: (b, 0, 0)),       # entities
            pl.BlockSpec((block_b, n_agents, ne), lambda b: (b, 0, 0)),     # 1 - pre_mask
            pl.BlockSpec((block_b, n_agents, 1), lambda b: (b, 0, 0)),      # 1 - post_mask
            pl.BlockSpec((in_dim, embed_dim), lambda b: (0, 0)),            # W_in
            pl.BlockSpec((1, embed_dim), lambda b: (0, 0)),                 # b_in
            pl.BlockSpec((embed_dim, out_dim), lambda b: (0, 0)),           # W_out
            pl.BlockSpec((1, out_dim), lambda b: (0, 0)),                   # b_out
        ],
        out_specs=pl.BlockSpec((block_b, n_agents, out_dim), lambda b: (b, 0, 0)),
        compiler_params=pltpu.CompilerParams(
            dimension_semantics=("parallel",)),
    )(ents, keep_pre, keep_post,
      w_in.astype(jnp.float32), b_in_2d, w_out.astype(jnp.float32), b_out_2d)

    return out[:bs]


def entity_pooling_reference(entities, pre_mask, post_mask, params, pooling_type):
    """Pure-JAX reference mirroring the PyTorch forward."""
    w_in, b_in, w_out, b_out = params
    bs, ne, _ = entities.shape
    n_agents = post_mask.shape[1]
    ents_trans = entities @ w_in + b_in                              # (bs, ne, embed)
    pre = pre_mask[:, :n_agents]                                     # (bs, na, ne)
    if pooling_type == "max":
        rep = jnp.broadcast_to(ents_trans[:, None],
                               (bs, n_agents, ne, ents_trans.shape[-1]))
        rep = jnp.where(pre[..., None], 0.0, rep)
        pooled = rep.max(axis=2)
    else:
        # masked_fill(pre, 0).mean(dim=2), written as the mathematically
        # identical mask matmul.
        keep = 1.0 - pre.astype(jnp.float32)
        pooled = jnp.einsum("bae,bek->bak", keep, ents_trans) / ne
    out = pooled @ w_out + b_out
    out = jnp.where(post_mask[..., None], 0.0, out)
    return out


def init_params(key, in_dim, embed_dim, out_dim):
    """Deterministic torch.nn.Linear-style init (U(-1/sqrt(fan_in), ...))."""
    k1, k2, k3, k4 = jax.random.split(key, 4)
    lim_in = 1.0 / jnp.sqrt(in_dim)
    lim_out = 1.0 / jnp.sqrt(embed_dim)
    w_in = jax.random.uniform(k1, (in_dim, embed_dim), jnp.float32,
                              -lim_in, lim_in)
    b_in = jax.random.uniform(k2, (embed_dim,), jnp.float32, -lim_in, lim_in)
    w_out = jax.random.uniform(k3, (embed_dim, out_dim), jnp.float32,
                               -lim_out, lim_out)
    b_out = jax.random.uniform(k4, (out_dim,), jnp.float32, -lim_out, lim_out)
    return (w_in, b_in, w_out, b_out)


if __name__ == "__main__":
    bs, ne, n_agents = 16, 8, 4
    in_dim = embed_dim = out_dim = 32   # in_dim == embed_dim (see note above)

    key = jax.random.PRNGKey(0)
    k_e, k_pre, k_post, k_p = jax.random.split(key, 4)

    entities = jax.random.normal(k_e, (bs, ne, in_dim), jnp.float32)
    pre_mask = jax.random.bernoulli(k_pre, 0.3, (bs, n_agents, ne))   # bool
    post_mask = jax.random.bernoulli(k_post, 0.25, (bs, n_agents))    # bool
    params = init_params(k_p, in_dim, embed_dim, out_dim)

    ok = True
    for pooling_type in ("max", "mean"):
        out = entity_pooling_forward(entities, pre_mask, post_mask,
                                     params, pooling_type, block_b=8)
        out = jax.block_until_ready(out)
        ref = entity_pooling_reference(entities, pre_mask, post_mask,
                                       params, pooling_type)
        # f32 matmuls on the MXU use bf16 passes at default precision, so allow
        # a modest tolerance (real bugs — wrong mask/bias/transpose — are >>1e-2).
        if not jnp.allclose(out, ref, atol=1e-3, rtol=1e-3):
            ok = False
            print(f"mismatch for pooling_type={pooling_type}: "
                  f"max abs err {jnp.max(jnp.abs(out - ref))}")

    if ok:
        print("KERNEL_OK")
</pallas_src>

<mosaic_0001>
module attributes {stable_mosaic.version = 11 : i64} {
  func.func @_entity_pooling_kernel(%arg0: i32, %arg1: memref<8x8x32xf32, #tpu.memory_space<vmem>>, %arg2: memref<8x4x8xf32, #tpu.memory_space<vmem>>, %arg3: memref<8x4x1xf32, #tpu.memory_space<vmem>>, %arg4: memref<32x32xf32, #tpu.memory_space<vmem>>, %arg5: memref<1x32xf32, #tpu.memory_space<vmem>>, %arg6: memref<32x32xf32, #tpu.memory_space<vmem>>, %arg7: memref<1x32xf32, #tpu.memory_space<vmem>>, %arg8: memref<8x4x32xf32, #tpu.memory_space<vmem>>) attributes {dimension_semantics = [#tpu.dimension_semantics<parallel>], iteration_bounds = array<i64: 2>, scalar_prefetch = 0 : i64, scratch_operands = 0 : i64, tpu.core_type = #tpu.core_type<tc>, window_params = [{transform_indices = @transform_0, window_bounds = array<i64: 8, 8, 32>}, {transform_indices = @transform_1, window_bounds = array<i64: 8, 4, 8>}, {transform_indices = @transform_2, window_bounds = array<i64: 8, 4, 1>}, {pipeline_mode = #tpu.pipeline_mode<synchronous>, transform_indices = @transform_3, window_bounds = array<i64: 32, 32>}, {pipeline_mode = #tpu.pipeline_mode<synchronous>, transform_indices = @transform_4, window_bounds = array<i64: 1, 32>}, {pipeline_mode = #tpu.pipeline_mode<synchronous>, transform_indices = @transform_5, window_bounds = array<i64: 32, 32>}, {pipeline_mode = #tpu.pipeline_mode<synchronous>, transform_indices = @transform_6, window_bounds = array<i64: 1, 32>}, {transform_indices = @transform_7, window_bounds = array<i64: 8, 4, 32>}]} {
    %c0 = arith.constant 0 : index
    %c0_0 = arith.constant 0 : index
    %c0_1 = arith.constant 0 : index
    %0 = vector.load %arg1[%c0, %c0_0, %c0_1] : memref<8x8x32xf32, #tpu.memory_space<vmem>>, vector<8x8x32xf32>
    %c0_2 = arith.constant 0 : index
    %c0_3 = arith.constant 0 : index
    %1 = vector.load %arg4[%c0_2, %c0_3] : memref<32x32xf32, #tpu.memory_space<vmem>>, vector<32x32xf32>
    %2 = vector.shape_cast %1 : vector<32x32xf32> to vector<1x32x32xf32>
    %3 = vector.broadcast %2 : vector<1x32x32xf32> to vector<8x32x32xf32>
    %cst = arith.constant dense<0.000000e+00> : vector<8x8x32xf32>
    %4 = tpu.matmul %0, %3, %cst {dimension_numbers = #tpu.dot_dimension_numbers<[2], [1], [1], [2], [0, 0, 0, 1, 1, 2], [0], [0]>} : vector<8x8x32xf32>, vector<8x32x32xf32>, vector<8x8x32xf32> -> vector<8x8x32xf32>
    %c0_4 = arith.constant 0 : index
    %c0_5 = arith.constant 0 : index
    %5 = vector.load %arg5[%c0_4, %c0_5] : memref<1x32xf32, #tpu.memory_space<vmem>>, vector<1x32xf32>
    %6 = vector.shape_cast %5 : vector<1x32xf32> to vector<1x1x32xf32>
    %7 = vector.broadcast %6 : vector<1x1x32xf32> to vector<8x8x32xf32>
    %8 = arith.addf %4, %7 : vector<8x8x32xf32>
    %c0_6 = arith.constant 0 : index
    %c0_7 = arith.constant 0 : index
    %c0_8 = arith.constant 0 : index
    %9 = vector.load %arg2[%c0_6, %c0_7, %c0_8] : memref<8x4x8xf32, #tpu.memory_space<vmem>>, vector<8x4x8xf32>
    %10 = vector.extract_strided_slice %9 {offsets = [0, 0, 0], sizes = [8, 4, 1], strides = [1, 1, 1]} : vector<8x4x8xf32> to vector<8x4x1xf32>
    %11 = vector.extract_strided_slice %8 {offsets = [0, 0, 0], sizes = [8, 1, 32], strides = [1, 1, 1]} : vector<8x8x32xf32> to vector<8x1x32xf32>
    %12 = vector.broadcast %10 : vector<8x4x1xf32> to vector<8x4x32xf32>
    %13 = vector.broadcast %11 : vector<8x1x32xf32> to vector<8x4x32xf32>
    %14 = arith.mulf %12, %13 : vector<8x4x32xf32>
    %15 = vector.extract_strided_slice %9 {offsets = [0, 0, 1], sizes = [8, 4, 1], strides = [1, 1, 1]} : vector<8x4x8xf32> to vector<8x4x1xf32>
    %16 = vector.extract_strided_slice %8 {offsets = [0, 1, 0], sizes = [8, 1, 32], strides = [1, 1, 1]} : vector<8x8x32xf32> to vector<8x1x32xf32>
    %17 = vector.broadcast %15 : vector<8x4x1xf32> to vector<8x4x32xf32>
    %18 = vector.broadcast %16 : vector<8x1x32xf32> to vector<8x4x32xf32>
    %19 = arith.mulf %17, %18 : vector<8x4x32xf32>
    %20 = arith.maximumf %14, %19 : vector<8x4x32xf32>
    %21 = vector.extract_strided_slice %9 {offsets = [0, 0, 2], sizes = [8, 4, 1], strides = [1, 1, 1]} : vector<8x4x8xf32> to vector<8x4x1xf32>
    %22 = vector.extract_strided_slice %8 {offsets = [0, 2, 0], sizes = [8, 1, 32], strides = [1, 1, 1]} : vector<8x8x32xf32> to vector<8x1x32xf32>
    %23 = vector.broadcast %21 : vector<8x4x1xf32> to vector<8x4x32xf32>
    %24 = vector.broadcast %22 : vector<8x1x32xf32> to vector<8x4x32xf32>
    %25 = arith.mulf %23, %24 : vector<8x4x32xf32>
    %26 = arith.maximumf %20, %25 : vector<8x4x32xf32>
    %27 = vector.extract_strided_slice %9 {offsets = [0, 0, 3], sizes = [8, 4, 1], strides = [1, 1, 1]} : vector<8x4x8xf32> to vector<8x4x1xf32>
    %28 = vector.extract_strided_slice %8 {offsets = [0, 3, 0], sizes = [8, 1, 32], strides = [1, 1, 1]} : vector<8x8x32xf32> to vector<8x1x32xf32>
    %29 = vector.broadcast %27 : vector<8x4x1xf32> to vector<8x4x32xf32>
    %30 = vector.broadcast %28 : vector<8x1x32xf32> to vector<8x4x32xf32>
    %31 = arith.mulf %29, %30 : vector<8x4x32xf32>
    %32 = arith.maximumf %26, %31 : vector<8x4x32xf32>
    %33 = vector.extract_strided_slice %9 {offsets = [0, 0, 4], sizes = [8, 4, 1], strides = [1, 1, 1]} : vector<8x4x8xf32> to vector<8x4x1xf32>
    %34 = vector.extract_strided_slice %8 {offsets = [0, 4, 0], sizes = [8, 1, 32], strides = [1, 1, 1]} : vector<8x8x32xf32> to vector<8x1x32xf32>
    %35 = vector.broadcast %33 : vector<8x4x1xf32> to vector<8x4x32xf32>
    %36 = vector.broadcast %34 : vector<8x1x32xf32> to vector<8x4x32xf32>
    %37 = arith.mulf %35, %36 : vector<8x4x32xf32>
    %38 = arith.maximumf %32, %37 : vector<8x4x32xf32>
    %39 = vector.extract_strided_slice %9 {offsets = [0, 0, 5], sizes = [8, 4, 1], strides = [1, 1, 1]} : vector<8x4x8xf32> to vector<8x4x1xf32>
    %40 = vector.extract_strided_slice %8 {offsets = [0, 5, 0], sizes = [8, 1, 32], strides = [1, 1, 1]} : vector<8x8x32xf32> to vector<8x1x32xf32>
    %41 = vector.broadcast %39 : vector<8x4x1xf32> to vector<8x4x32xf32>
    %42 = vector.broadcast %40 : vector<8x1x32xf32> to vector<8x4x32xf32>
    %43 = arith.mulf %41, %42 : vector<8x4x32xf32>
    %44 = arith.maximumf %38, %43 : vector<8x4x32xf32>
    %45 = vector.extract_strided_slice %9 {offsets = [0, 0, 6], sizes = [8, 4, 1], strides = [1, 1, 1]} : vector<8x4x8xf32> to vector<8x4x1xf32>
    %46 = vector.extract_strided_slice %8 {offsets = [0, 6, 0], sizes = [8, 1, 32], strides = [1, 1, 1]} : vector<8x8x32xf32> to vector<8x1x32xf32>
    %47 = vector.broadcast %45 : vector<8x4x1xf32> to vector<8x4x32xf32>
    %48 = vector.broadcast %46 : vector<8x1x32xf32> to vector<8x4x32xf32>
    %49 = arith.mulf %47, %48 : vector<8x4x32xf32>
    %50 = arith.maximumf %44, %49 : vector<8x4x32xf32>
    %51 = vector.extract_strided_slice %9 {offsets = [0, 0, 7], sizes = [8, 4, 1], strides = [1, 1, 1]} : vector<8x4x8xf32> to vector<8x4x1xf32>
    %52 = vector.extract_strided_slice %8 {offsets = [0, 7, 0], sizes = [8, 1, 32], strides = [1, 1, 1]} : vector<8x8x32xf32> to vector<8x1x32xf32>
    %53 = vector.broadcast %51 : vector<8x4x1xf32> to vector<8x4x32xf32>
    %54 = vector.broadcast %52 : vector<8x1x32xf32> to vector<8x4x32xf32>
    %55 = arith.mulf %53, %54 : vector<8x4x32xf32>
    %56 = arith.maximumf %50, %55 : vector<8x4x32xf32>
    %c0_9 = arith.constant 0 : index
    %c0_10 = arith.constant 0 : index
    %57 = vector.load %arg6[%c0_9, %c0_10] : memref<32x32xf32, #tpu.memory_space<vmem>>, vector<32x32xf32>
    %58 = vector.shape_cast %57 : vector<32x32xf32> to vector<1x32x32xf32>
    %59 = vector.broadcast %58 : vector<1x32x32xf32> to vector<8x32x32xf32>
    %cst_11 = arith.constant dense<0.000000e+00> : vector<8x4x32xf32>
    %60 = tpu.matmul %56, %59, %cst_11 {dimension_numbers = #tpu.dot_dimension_numbers<[2], [1], [1], [2], [0, 0, 0, 1, 1, 2], [0], [0]>} : vector<8x4x32xf32>, vector<8x32x32xf32>, vector<8x4x32xf32> -> vector<8x4x32xf32>
    %c0_12 = arith.constant 0 : index
    %c0_13 = arith.constant 0 : index
    %61 = vector.load %arg7[%c0_12, %c0_13] : memref<1x32xf32, #tpu.memory_space<vmem>>, vector<1x32xf32>
    %62 = vector.shape_cast %61 : vector<1x32xf32> to vector<1x1x32xf32>
    %63 = vector.broadcast %62 : vector<1x1x32xf32> to vector<8x4x32xf32>
    %64 = arith.addf %60, %63 : vector<8x4x32xf32>
    %c0_14 = arith.constant 0 : index
    %c0_15 = arith.constant 0 : index
    %c0_16 = arith.constant 0 : index
    %65 = vector.load %arg3[%c0_14, %c0_15, %c0_16] : memref<8x4x1xf32, #tpu.memory_space<vmem>>, vector<8x4x1xf32>
    %66 = vector.broadcast %65 : vector<8x4x1xf32> to vector<8x4x32xf32>
    %67 = arith.mulf %64, %66 : vector<8x4x32xf32>
    %c0_17 = arith.constant 0 : index
    %c0_18 = arith.constant 0 : index
    %c0_19 = arith.constant 0 : index
    %68 = vector.load %arg8[%c0_17, %c0_18, %c0_19] : memref<8x4x32xf32, #tpu.memory_space<vmem>>, vector<8x4x32xf32>
    tpu.vector_store %arg8[%c0_17, %c0_18, %c0_19], %67 {strides = array<i32>} : memref<8x4x32xf32, #tpu.memory_space<vmem>>, vector<8x4x32xf32>,
    return
  }
  func.func @transform_0(%arg0: i32) -> (i32, i32, i32) {
    %c0_i32 = arith.constant 0 : i32
    %c0_i32_0 = arith.constant 0 : i32
    %c0_i32_1 = arith.constant 0 : i32
    return %arg0, %c0_i32, %c0_i32_0 : i32, i32, i32
  }
  func.func @transform_1(%arg0: i32) -> (i32, i32, i32) {
    %c0_i32 = arith.constant 0 : i32
    %c0_i32_0 = arith.constant 0 : i32
    %c0_i32_1 = arith.constant 0 : i32
    return %arg0, %c0_i32, %c0_i32_0 : i32, i32, i32
  }
  func.func @transform_2(%arg0: i32) -> (i32, i32, i32) {
    %c0_i32 = arith.constant 0 : i32
    %c0_i32_0 = arith.constant 0 : i32
    %c0_i32_1 = arith.constant 0 : i32
    return %arg0, %c0_i32, %c0_i32_0 : i32, i32, i32
  }
  func.func @transform_3(%arg0: i32) -> (i32, i32) {
    %c0_i32 = arith.constant 0 : i32
    %c0_i32_0 = arith.constant 0 : i32
    %c0_i32_1 = arith.constant 0 : i32
    return %c0_i32, %c0_i32_0 : i32, i32
  }
  func.func @transform_4(%arg0: i32) -> (i32, i32) {
    %c0_i32 = arith.constant 0 : i32
    %c0_i32_0 = arith.constant 0 : i32
    %c0_i32_1 = arith.constant 0 : i32
    return %c0_i32, %c0_i32_0 : i32, i32
  }
  func.func @transform_5(%arg0: i32) -> (i32, i32) {
    %c0_i32 = arith.constant 0 : i32
    %c0_i32_0 = arith.constant 0 : i32
    %c0_i32_1 = arith.constant 0 : i32
    return %c0_i32, %c0_i32_0 : i32, i32
  }
  func.func @transform_6(%arg0: i32) -> (i32, i32) {
    %c0_i32 = arith.constant 0 : i32
    %c0_i32_0 = arith.constant 0 : i32
    %c0_i32_1 = arith.constant 0 : i32
    return %c0_i32, %c0_i32_0 : i32, i32
  }
  func.func @transform_7(%arg0: i32) -> (i32, i32, i32) {
    %c0_i32 = arith.constant 0 : i32
    %c0_i32_0 = arith.constant 0 : i32
    %c0_i32_1 = arith.constant 0 : i32
    return %arg0, %c0_i32, %c0_i32_0 : i32, i32, i32
  }
}

</mosaic_0001>

<bundles_post_ra>
// kernel: tpu_custom_call.1
= control target key start
LH: loop header
LB: loop body
LE: loop exit
PB: predicated region body
PF: predicated region fallthrough
CT: control target
= control target key end

     0   :  { %12 = vsyncpa [#allocation3], 0  ;;  %s3777_s0 = inlined_call_operand.vmem [shape: f32[16,8,32], index: 0, kind: input, shape index: {}]   ;;  %s3778_s1 = inlined_call_operand.vmem [shape: f32[16,4,8], index: 1, kind: input, shape index: {}]   ;;  %s3779_s2 = inlined_call_operand.vmem [shape: f32[16,4,1], index: 2, kind: input, shape index: {}]   ;;  %s3780_s3 = inlined_call_operand.vmem [shape: f32[32,32], index: 3, kind: input, shape index: {}]   ;;  %s3781_s4 = inlined_call_operand.vmem [shape: f32[1,32], index: 4, kind: input, shape index: {}]   ;;  %s3782_s5 = inlined_call_operand.hbm [shape: f32[32,32], index: 5, kind: input, shape index: {}]   ;;  %s3783_s6 = inlined_call_operand.vmem [shape: f32[1,32], index: 6, kind: input, shape index: {}]   ;;  %s3784_s7 = inlined_call_operand.hbm [shape: f32[16,4,32], index: 7, kind: output, shape index: {}]  }
   0x1   :  { %13 = vsyncpa [#allocation4], 0 }
   0x2   :  { %15 = vsyncpa [#allocation4 + $0x1], 0  ;;  %s2911_s24 = smov 0   ;;  %s2913_s25 = smov 0  }
   0x3   :  { %s2915_s26 = smov 0   ;;  %s2917_s27 = smov 0  }
   0x4 LB: > { %s2932_s28 = sadd.s32 4294967295, %s2853_s27   ;;  %s2363_s29 = sadd.s32 4294967294, %s2853_s27   ;;  %s2853_s27 = sphi %s2917_s27, %s3792_s27   ;;  %s2849_s26 = sphi %s2915_s26, %s3791_s26   ;;  %s2845_s25 = sphi %s2913_s25, %s3790_s25   ;;  %s2841_s24 = sphi %s2911_s24, %s3789_s24  }
   0x5   : > { %s2936_s30 = sadd.s32 1, %s2853_s27   ;;  %s190_s8 = sadd.s32 1, %s2849_s26 }
   0x6   : > { %s187_s9 = ssub.s32 %s2853_s27, %s2936_s30  ;;  %p200_p0 = scmp.ne.s32.totalorder %s2849_s26, %s2845_s25 }
   0x7   : > { %p188_p1 = scmp.eq.s32.totalorder %s187_s9, 0  ;;  %p201_p2 = scmp.eq.s32.totalorder %s2932_s28, 1 }
   0x8   : > { %p206_p3 = scmp.ne.s32.totalorder %s2845_s25, %s2841_s24  ;;  %p207_p4 = scmp.eq.s32.totalorder %s2363_s29, 1 }
   0x9   : > { %s2947_s10 = scalar_select %p188_p1, %s2849_s26, %s190_s8  }
   0xa   : > { %p2949_p5 = por %p201_p2, %p200_p0  ;;  %p2953_p6 = por %p207_p4, %p206_p3 }
   0xb   : > { %p2364_p7 = scmp.ge.s32.totalorder %s2853_s27, 1  ;;  %p214_p8 = scmp.lt.s32.totalorder %s2853_s27, 3 }
   0xc   : > { %s3786_s12 = scalar_select %p2953_p6, 1, 0 }
   0xd   : > { %p2670_p9 = scmp.eq.s32.totalorder %s2932_s28, 0  ;;  %p2960_p10 = pnand %p2364_p7, %p214_p8 }
   0xe   : > { %s2855_s14 = smov [#allocation2]  }
   0xf   : > { %s232_s15 = sshll.u32 %s2855_s14, 4  ;;  %p2662_p11 = pneg %p2960_p10  ;;  %s233_s15 = int_to_ptr.vmem [resolvable:$true] %s232_s15 }
  0x10   : > { %s2774_s16 = scalar_lea.vmem %s233_s15, 512  ;;  %p2782_p3 = scmp.lt.s32.totalorder %s233_s15, %s233_s15 }
  0x11   : > { %p2663_p12 = pnand %p2670_p9, %p2662_p11  ;;  %p2775_p0 = scmp.ne.s32.totalorder %s233_s15, %s2774_s16 }
  0x12   : > { %p2783_p4 = scmp.lt.s32.totalorder %s2774_s16, %s2774_s16 }
  0x13   : > { %p2765_p13 = pneg %p2663_p12 }
  0x14   : > { %p2784_p6 = por %p2783_p4, %p2782_p3 }
  0x15   : > { %p2777_p1 = pnand %p2775_p0, %p2765_p13 }
  0x17   : > { %p2778_p2 = pneg %p2777_p1 }
  0x19   : > { %p2785_p7 = pnand %p2784_p6, %p2778_p2 }
  0x1b   : > { %2788 = shalt.err (!%p2785_p7)
}
  0x1c   : > { %s2856_s17 = smov 128   ;;  %s2857_s18 = smov 8  }
  0x1d   : > { %2665 = dma.hbm_to_vmem [thread:$0]  (!%p2663_p12), %s3782_s5, 512, %s233_s15, [#allocation3], %s2856_s17, %s2856_s17, %s2857_s18  }
  0x1e   : > { %278 = sbr.rel (%p2960_p10) target bundleno = 582 (0x246), region = 48 }
  0x23   : > { %2832 = dma.done.wait (%p2670_p9), [#allocation3], 512  }
  0x24   : > { %2834 = vsyncadd (%p2670_p9), [#allocation3], 4294966784  ;;  %s2370_s21 = sshll.u32 %s2932_s28, 3  ;;  %v2858_v0 = vmov 1   ;;  %v2859_v1 = vmov 0.0   ;;  %vm2860_vm0 = vmmov 0   ;;  %v991_v57 = vlaneseq }
  0x25   : > { %2720 = vset.pattern.permute.xlu1 %v2858_v0  ;;  %2480 = vmatprep.subr.mxu0 %v2859_v1  ;;  %p321_p6 = scmp.lt.s32.totalorder %s2370_s21, 15  ;;  %v3002_v3 = vld [vmem:[%s3780_s3 + $0x18] sm:$0xff]  ;;  %v3007_v4 = vld [vmem:[%s3780_s3 + $0x10] sm:$0xff]  ;;  %v3022_v6 = vld [vmem:[%s3780_s3 + $0x8] sm:$0xff]  ;;  %vm358_vm1 = vcmask 261120   ;;  %v2861_v10 = vmov 2  }
  0x26   : > { %2491 = vmatprep.subr.mxu1 %v2859_v1  ;;  %2488 = vmatprep.mubr.msk.f32.mxu0 %vm2860_vm0, %v2859_v1  ;;  %v3036_v7 = vld [vmem:[%s3780_s3] sm:$0xff]  ;;  %v2862_v11 = vmov 3   ;;  %v2863_v15 = vmov 4   ;;  %v2864_v19 = vmov 5   ;;  %v2865_v20 = vmov 0   ;;  %v3196_v29 = vld [vmem:[#allocation2 + $0x18] sm:$0xff] }
  0x27   : > { %s3794_s21 = smov (!%p321_p6, %s2370_s21), 15  ;;  %2499 = vmatprep.mubr.msk.f32.mxu1 %vm2860_vm0, %v2859_v1  ;;  %2726 = vset.pattern.permute.xlu0 %v2858_v0  ;;  %v2866_v21 = vmov 6   ;;  %v2867_v26 = vmov 7   ;;  %v3202_v30 = vld [vmem:[#allocation2 + $0x10] sm:$0xff]  ;;  %v3208_v31 = vld [vmem:[#allocation2 + $0x8] sm:$0xff]  ;;  %v3218_v32 = vld [vmem:[#allocation2] sm:$0xff] }
  0x28   : > { %s2373_s22 = sshll.u32 %s3794_s21, 2  ;;  %s2371_s16 = sshll.u32 %s3794_s21, 3  ;;  %2481 = vmatpush3.msra.mxu0 %v3002_v3  ;;  %2492 = vmatpush3.msra.mxu1 %v3002_v3  ;;  %v992_v60 = vshrl.u32 %v991_v57, 7  ;;  %vm2242_vm2 = vcmask 257024  }
  0x29   : > { %s2994_s8 = scalar_lea.vmem %s3778_s1, %s2373_s22  ;;  %2482 = vmatprep.subr.mxu0 %v2859_v1  ;;  %2493 = vmatprep.subr.mxu1 %v2859_v1  ;;  %s3027_s23 = scalar_lea.vmem %s3777_s0, %s2371_s16 }
  0x2a   : > { %v2997_v2 = vld [vmem:[%s2994_s8] sm:$0xf]  ;;  %v3015_v5 = vld [vmem:[%s2994_s8 + $0x4] sm:$0xf]  ;;  %2483 = vmatpush3.msra.mxu0 %v3007_v4  ;;  %2494 = vmatpush3.msra.mxu1 %v3007_v4  ;;  %v340_v9 = vld [vmem:[%s3027_s23 + $0x8] sm:$0xff]  ;;  %s3293_s14 = scalar_lea.vmem %s3779_s2, %s2373_s22  ;;  %s317_s15 = sand.u32 1, %s2845_s25  }
  0x2b   : > { %1032 = vperm.xlu1 %2720, %v2997_v2   ;;  %2484 = vmatprep.subr.mxu0 %v2859_v1  ;;  %v339_v8 = vld [vmem:[%s3027_s23] sm:$0xff]  ;;  %v341_v12 = vld [vmem:[%s3027_s23 + $0x10] sm:$0xff]  ;;  %v342_v13 = vld [vmem:[%s3027_s23 + $0x18] sm:$0xff]  ;;  %s2369_s18 = sshll.u32 %s317_s15, 5  ;;  %s2399_s20 = sshll.u32 %s2932_s28, 9 }
  0x2c   : > { %2495 = vmatprep.subr.mxu1 %v2859_v1  ;;  %2485 = vmatpush3.msra.mxu0 %v3022_v6  ;;  %v3077_v14 = vld [vmem:[%s2994_s8 + $0xc] sm:$0xf]  ;;  %v3090_v16 = vld [vmem:[%s2994_s8 + $0x10] sm:$0xf]  ;;  %v343_v17 = vld [vmem:[%s3027_s23 + $0x20] sm:$0xff]  ;;  %s3708_s19 = scalar_lea.vmem [#allocation5], %s2369_s18 }
  0x2d   : > { %2496 = vmatpush3.msra.mxu1 %v3022_v6  ;;  %2486 = vmatprep.subr.mxu0 %v2859_v1  ;;  %v344_v18 = vld [vmem:[%s3027_s23 + $0x28] sm:$0xff]  ;;  %v345_v23 = vld [vmem:[%s3027_s23 + $0x30] sm:$0xff]  ;;  %v346_v24 = vld [vmem:[%s3027_s23 + $0x38] sm:$0xff]  ;;  %s2265_s23 = sshll.u32 %s3708_s19, 4  ;;  %s3737_s28 = scalar_lea.sflag [#allocation4], %s317_s15  ;;  %s3731_s23 = int_to_ptr.vmem [resolvable:$true] %s2265_s23 }
  0x2e   : > { %2497 = vmatprep.subr.mxu1 %v2859_v1  ;;  %2487 = vmatpush3.msra.mxu0 %v3036_v7  ;;  %v3124_v22 = vld [vmem:[%s2994_s8 + $0x8] sm:$0xf]  ;;  %v3170_v25 = vld [vmem:[%s2994_s8 + $0x1c] sm:$0xf]  ;;  %v3186_v27 = vld [vmem:[%s2994_s8 + $0x14] sm:$0xf] }
  0x2f   : > { %1036 = vperm.xlu1 %2720, %v3015_v5   ;;  %2498 = vmatpush3.msra.mxu1 %v3036_v7  ;;  %v3192_v28 = vld [vmem:[%s2994_s8 + $0x18] sm:$0xf]  ;;  %v2186_v48 = vld [vmem:[%s3293_s14] sm:$0xf]  ;;  %v2189_v62 = vld [vmem:[%s3293_s14 + $0xc] sm:$0xf]  ;;  %s3729_s8 = scalar_lea.hbm %s3784_s7, %s2399_s20 }
  0x30   : > { %2489 = vmatmul.mubr.msk.f32.vlgmr.msra.gmra.mxu0 %vm358_vm1, %v339_v8  ;;  %2500 = vmatmul.mubr.msk.f32.vlgmr.msra.gmra.mxu1 %vm358_vm1, %v340_v9  ;;  %s2789_s13 = scalar_lea.vmem %s3731_s23, 512 }
  0x31   : > { %2502 = vmatprep.subr.mxu0 %v2859_v1  ;;  %2513 = vmatprep.subr.mxu1 %v2859_v1  ;;  %p2790_p8 = scmp.ne.s32.totalorder %s3731_s23, %s2789_s13 }
  0x32   : > { %2503 = vmatpush3.msra.mxu0 %v3002_v3  ;;  %2514 = vmatpush3.msra.mxu1 %v3002_v3 }
  0x33   : > { %2721 = vset.pattern.permute.xlu1 %v2861_v10  ;;  %2504 = vmatprep.subr.mxu0 %v2859_v1  ;;  %p2791_p9 = pnand %p2790_p8, %p2949_p5 }
  0x34   : > { %1116 = vperm.xlu1 %2721, %v3015_v5   ;;  %2515 = vmatprep.subr.mxu1 %v2859_v1 }
  0x35   : > { %2505 = vmatpush3.msra.mxu0 %v3007_v4  ;;  %2516 = vmatpush3.msra.mxu1 %v3007_v4  ;;  %p2792_p10 = pneg %p2791_p9 }
  0x36   : > { %2506 = vmatprep.subr.mxu0 %v2859_v1  ;;  %2517 = vmatprep.subr.mxu1 %v2859_v1 }
  0x37   : > { %2507 = vmatpush3.msra.mxu0 %v3022_v6  ;;  %2518 = vmatpush3.msra.mxu1 %v3022_v6 }
  0x38   : > { %2722 = vset.pattern.permute.xlu1 %v2862_v11  ;;  %2508 = vmatprep.subr.mxu0 %v2859_v1 }
  0x39   : > { %2519 = vmatprep.subr.mxu1 %v2859_v1  ;;  %1192 = vperm.xlu1 %2722, %v2997_v2  }
  0x3a   : > { %2509 = vmatpush3.msra.mxu0 %v3036_v7  ;;  %2510 = vmatprep.mubr.msk.f32.mxu0 %vm2860_vm0, %v2859_v1 }
  0x3b   : > { %2520 = vmatpush3.msra.mxu1 %v3036_v7  ;;  %2521 = vmatprep.mubr.msk.f32.mxu1 %vm2860_vm0, %v2859_v1 }
  0x3c   : > { %2511 = vmatmul.mubr.msk.f32.vlgmr.msra.gmra.mxu0 %vm358_vm1, %v341_v12  ;;  %2522 = vmatmul.mubr.msk.f32.vlgmr.msra.gmra.mxu1 %vm358_vm1, %v342_v13 }
  0x3d   : > { %2524 = vmatprep.subr.mxu0 %v2859_v1  ;;  %2535 = vmatprep.subr.mxu1 %v2859_v1 }
  0x3e   : > { %2525 = vmatpush3.msra.mxu0 %v3002_v3  ;;  %2536 = vmatpush3.msra.mxu1 %v3002_v3 }
  0x3f   : > { %1044 = vperm.xlu0 %2726, %v3077_v14   ;;  %2526 = vmatprep.subr.mxu0 %v2859_v1 }
  0x40   : > { %2537 = vmatprep.subr.mxu1 %v2859_v1  ;;  %2723 = vset.pattern.permute.xlu1 %v2863_v15 }
  0x41   : > { %2527 = vmatpush3.msra.mxu0 %v3007_v4  ;;  %2538 = vmatpush3.msra.mxu1 %v3007_v4 }
  0x42   : > { %1272 = vperm.xlu1 %2723, %v2997_v2   ;;  %2528 = vmatprep.subr.mxu0 %v2859_v1 }
  0x43   : > { %2539 = vmatprep.subr.mxu1 %v2859_v1  ;;  %2529 = vmatpush3.msra.mxu0 %v3022_v6 }
  0x44   : > { %2540 = vmatpush3.msra.mxu1 %v3022_v6  ;;  %1048 = vperm.xlu0 %2726, %v3090_v16  }
  0x45   : > { %2530 = vmatprep.subr.mxu0 %v2859_v1  ;;  %2541 = vmatprep.subr.mxu1 %v2859_v1 }
  0x46   : > { %2531 = vmatpush3.msra.mxu0 %v3036_v7  ;;  %2532 = vmatprep.mubr.msk.f32.mxu0 %vm2860_vm0, %v2859_v1 }
  0x47   : > { %2542 = vmatpush3.msra.mxu1 %v3036_v7  ;;  %2543 = vmatprep.mubr.msk.f32.mxu1 %vm2860_vm0, %v2859_v1 }
  0x48   : > { %1276 = vperm.xlu1 %2723, %v3015_v5   ;;  %2533 = vmatmul.mubr.msk.f32.vlgmr.msra.gmra.mxu0 %vm358_vm1, %v343_v17  ;;  %v3355_v17 = vsub.s32 3, %v992_v60 }
  0x49   : > { %2544 = vmatmul.mubr.msk.f32.vlgmr.msra.gmra.mxu1 %vm358_vm1, %v344_v18  ;;  %2736 = vset.pattern.permute.xlu0 %v2864_v19  ;;  %v3357_v18 = vsub.s32 4, %v992_v60 }
  0x4a   : > { %1364 = vperm.xlu0 %2736, %v3077_v14   ;;  %2546 = vmatprep.subr.mxu0 %v2859_v1 }
  0x4b   : > { %2557 = vmatprep.subr.mxu1 %v2859_v1  ;;  %2547 = vmatpush3.msra.mxu0 %v3002_v3 }
  0x4c   : > { %2724 = vset.pattern.permute.xlu1 %v2865_v20  ;;  %2558 = vmatpush3.msra.mxu1 %v3002_v3  ;;  %v3333_v3 = vsub.s32 1, %v992_v60 }
  0x4d   : > { %968 = vperm.xlu1 %2724, %v3077_v14   ;;  %2548 = vmatprep.subr.mxu0 %v2859_v1 }
  0x4e   : > { %2737 = vset.pattern.permute.xlu0 %v2866_v21  ;;  %2559 = vmatprep.subr.mxu1 %v2859_v1 }
  0x4f   : > { %1436 = vperm.xlu0 %2737, %v3015_v5   ;;  %2549 = vmatpush3.msra.mxu0 %v3007_v4 }
  0x50   : > { %2560 = vmatpush3.msra.mxu1 %v3007_v4  ;;  %2550 = vmatprep.subr.mxu0 %v2859_v1  ;;  %v3335_v4 = vsub.s32 2, %v992_v60 }
  0x51   : > { %2725 = vset.pattern.permute.xlu1 %v2858_v0  ;;  %2561 = vmatprep.subr.mxu1 %v2859_v1 }
  0x52   : > { %1040 = vperm.xlu1 %2725, %v3124_v22   ;;  %2551 = vmatpush3.msra.mxu0 %v3022_v6 }
  0x53   : > { %1440 = vperm.xlu0 %2737, %v3124_v22   ;;  %2562 = vmatpush3.msra.mxu1 %v3022_v6 }
  0x54   : > { %2552 = vmatprep.subr.mxu0 %v2859_v1  ;;  %2563 = vmatprep.subr.mxu1 %v2859_v1 }
  0x55   : > { %2553 = vmatpush3.msra.mxu0 %v3036_v7  ;;  %2554 = vmatprep.mubr.msk.f32.mxu0 %vm2860_vm0, %v2859_v1 }
  0x56   : > { %2727 = vset.pattern.permute.xlu1 %v2864_v19  ;;  %2564 = vmatpush3.msra.mxu1 %v3036_v7 }
  0x57   : > { %1352 = vperm.xlu1 %2727, %v2997_v2   ;;  %2739 = vset.pattern.permute.xlu0 %v2863_v15 }
  0x58   : > { %1284 = vperm.xlu0 %2739, %v3077_v14   ;;  %2565 = vmatprep.mubr.msk.f32.mxu1 %vm2860_vm0, %v2859_v1 }
  0x59   : > { %2555 = vmatmul.mubr.msk.f32.vlgmr.msra.gmra.mxu0 %vm358_vm1, %v345_v23  ;;  %2566 = vmatmul.mubr.msk.f32.vlgmr.msra.gmra.mxu1 %vm358_vm1, %v346_v24 }
  0x5a   : > { %2568 = vmatprep.subr.mxu0 %v2859_v1  ;;  %2579 = vmatprep.subr.mxu1 %v2859_v1 }
  0x5b   : > { %1356 = vperm.xlu1 %2727, %v3015_v5   ;;  %2576 = vmatprep.mubr.msk.f32.mxu0 %vm2860_vm0, %v2859_v1 }
  0x5c   : > { %1288 = vperm.xlu0 %2739, %v3090_v16   ;;  %2587 = vmatprep.mubr.msk.f32.mxu1 %vm2860_vm0, %v2859_v1 }
  0x5d   : > { %2569 = vmatpush3.msra.mxu0 %v3196_v29  ;;  %2580 = vmatpush3.msra.mxu1 %v3196_v29 }
  0x5e   : > { %2570 = vmatprep.subr.mxu0 %v2859_v1  ;;  %2581 = vmatprep.subr.mxu1 %v2859_v1 }
  0x5f   : > { %2728 = vset.pattern.permute.xlu1 %v2861_v10  ;;  %2571 = vmatpush3.msra.mxu0 %v3202_v30 }
  0x60   : > { %1124 = vperm.xlu1 %2728, %v3077_v14   ;;  %2743 = vset.pattern.permute.xlu0 %v2865_v20 }
  0x61   : > { %953 = vperm.xlu0 %2743, %v2997_v2   ;;  %2582 = vmatpush3.msra.mxu1 %v3202_v30 }
  0x62   : > { %2572 = vmatprep.subr.mxu0 %v2859_v1  ;;  %2583 = vmatprep.subr.mxu1 %v2859_v1 }
  0x63   : > { %2573 = vmatpush3.msra.mxu0 %v3208_v31  ;;  %2584 = vmatpush3.msra.mxu1 %v3208_v31 }
  0x64   : > { %2729 = vset.pattern.permute.xlu1 %v2866_v21  ;;  %2574 = vmatprep.subr.mxu0 %v2859_v1 }
  0x65   : > { %1432 = vperm.xlu1 %2729, %v2997_v2   ;;  %958 = vperm.xlu0 %2743, %v3015_v5  }
  0x66   : > { %2585 = vmatprep.subr.mxu1 %v2859_v1  ;;  %2575 = vmatpush3.msra.mxu0 %v3218_v32 }
  0x67   : > { %2586 = vmatpush3.msra.mxu1 %v3218_v32  ;;  %2590 = vmatprep.subr.mxu0 %v2859_v1 }
  0x68   : > { %2601 = vmatprep.subr.mxu1 %v2859_v1 }
  0x69   : > { %2730 = vset.pattern.permute.xlu1 %v2862_v11  ;;  %963 = vperm.xlu0 %2743, %v3124_v22  }
  0x6a   : > { %1200 = vperm.xlu1 %2730, %v3124_v22  }
  0x6d   : > { %988 = vperm.xlu0 %2743, %v3170_v25  }
  0x6e   : > { %1204 = vperm.xlu1 %2730, %v3077_v14  }
  0x71   : > { %2746 = vset.pattern.permute.xlu0 %v2861_v10 }
  0x72   : > { %2731 = vset.pattern.permute.xlu1 %v2867_v26  ;;  %1112 = vperm.xlu0 %2746, %v2997_v2  }
  0x73   : > { %1516 = vperm.xlu1 %2731, %v3015_v5  }
  0x76   : > { %1120 = vperm.xlu0 %2746, %v3124_v22  }
  0x77   : > { %2732 = vset.pattern.permute.xlu1 %v2863_v15 }
  0x78   : > { %1280 = vperm.xlu1 %2732, %v3124_v22  }
  0x7a   : > { %1140 = vperm.xlu0 %2746, %v3170_v25  }
  0x7c   : > { %2733 = vset.pattern.permute.xlu1 %v2865_v20 }
  0x7d   : > { %973 = vperm.xlu1 %2733, %v3090_v16  }
  0x7e   : > { %2750 = vset.pattern.permute.xlu0 %v2862_v11 }
  0x7f   : > { %1196 = vperm.xlu0 %2750, %v3015_v5  }
  0x81   : > { %978 = vperm.xlu1 %2733, %v3186_v27  }
  0x83   : > { %1212 = vperm.xlu0 %2750, %v3186_v27  }
  0x85   : > { %2734 = vset.pattern.permute.xlu1 %v2858_v0 }
  0x86   : > { %1052 = vperm.xlu1 %2734, %v3186_v27  }
  0x87   : > { %1216 = vperm.xlu0 %2750, %v3192_v28  }
  0x8a   : > { %2735 = vset.pattern.permute.xlu1 %v2864_v19 }
  0x8b   : > { %1360 = vperm.xlu1 %2735, %v3124_v22   ;;  %2752 = vset.pattern.permute.xlu0 %v2867_v26 }
  0x8c   : > { %1512 = vperm.xlu0 %2752, %v2997_v2   ;;  %v3331_v2 = vsub.s32 0, %v992_v60 }
  0x8f   : > { %2738 = vset.pattern.permute.xlu1 %v2861_v10 }
  0x90   : > { %1128 = vperm.xlu1 %2738, %v3090_v16   ;;  %1532 = vperm.xlu0 %2752, %v3186_v27  }
  0x94   : > { %1132 = vperm.xlu1 %2738, %v3186_v27   ;;  %2755 = vset.pattern.permute.xlu0 %v2864_v19 }
  0x95   : > { %1368 = vperm.xlu0 %2755, %v3090_v16  }
  0x98   : > { %2740 = vset.pattern.permute.xlu1 %v2866_v21 }
  0x99   : > { %1444 = vperm.xlu1 %2740, %v3077_v14   ;;  %1376 = vperm.xlu0 %2755, %v3192_v28  }
  0x9d   : > { %2741 = vset.pattern.permute.xlu1 %v2862_v11  ;;  %2759 = vset.pattern.permute.xlu0 %v2866_v21 }
  0x9e   : > { %1208 = vperm.xlu1 %2741, %v3090_v16   ;;  %1460 = vperm.xlu0 %2759, %v3170_v25  }
  0xa2   : > { %2742 = vset.pattern.permute.xlu1 %v2867_v26  ;;  %2761 = vset.pattern.permute.xlu0 %v2865_v20 }
  0xa3   : > { %1520 = vperm.xlu1 %2742, %v3124_v22   ;;  %2196 = vperm.xlu0 %2761, %v2186_v48  }
  0xa6   : > { %v3241_v33 = vpop.permute.xlu1 %1032 }
  0xa7   : > { %1524 = vperm.xlu1 %2742, %v3077_v14   ;;  %2211 = vperm.xlu0 %2761, %v2189_v62  }
  0xaa   : > { %v3245_v34 = vpop.permute.xlu1 %1036 }
  0xab   : > { %2744 = vset.pattern.permute.xlu1 %v2863_v15 }
  0xac   : > { %1292 = vperm.xlu1 %2744, %v3186_v27  }
  0xaf   : > { %v3250_v35 = vpop.permute.xlu1 %1116 }
  0xb0   : > { %2745 = vset.pattern.permute.xlu1 %v2865_v20 }
  0xb1   : > { %983 = vperm.xlu1 %2745, %v3192_v28  }
  0xb4   : > { %v3254_v36 = vpop.permute.xlu1 %1192 }
  0xb5   : > { %2747 = vset.pattern.permute.xlu1 %v2858_v0  ;;  %v3328_v0 = vld [vmem:[%s3781_s4] ss:$0 sm:$0xff] }
  0xb6   : > { %1056 = vperm.xlu1 %2747, %v3192_v28  }
  0xba   : > { %1060 = vperm.xlu1 %2747, %v3170_v25   ;;  %v3257_v37 = vpop.permute.xlu0 %1044 }
  0xbd   : > { %v3259_v38 = vpop.permute.xlu1 %1272 }
  0xbe   : > { %2748 = vset.pattern.permute.xlu1 %v2864_v19 }
  0xbf   : > { %1372 = vperm.xlu1 %2748, %v3186_v27   ;;  %v3263_v39 = vpop.permute.xlu0 %1048 }
  0xc3   : > { %2749 = vset.pattern.permute.xlu1 %v2861_v10  ;;  %v3266_v40 = vpop.permute.xlu1 %1276 }
  0xc4   : > { %1136 = vperm.xlu1 %2749, %v3192_v28  }
  0xc5   : > { %v3269_v41 = vpop.permute.xlu0 %1364 }
  0xc8   : > { %2751 = vset.pattern.permute.xlu1 %v2866_v21  ;;  %v3272_v42 = vpop.permute.xlu1 %968 }
  0xc9   : > { %1448 = vperm.xlu1 %2751, %v3090_v16  }
  0xca   : > { %v3275_v43 = vpop.permute.xlu0 %1436 }
  0xcd   : > { %1452 = vperm.xlu1 %2751, %v3186_v27   ;;  %v3278_v44 = vpop.permute.xlu1 %1040 }
  0xce   : > { %v3280_v45 = vpop.permute.xlu0 %1440 }
  0xd1   : > { %2753 = vset.pattern.permute.xlu1 %v2862_v11 }
  0xd2   : > { %1220 = vperm.xlu1 %2753, %v3170_v25   ;;  %v3284_v46 = vpop.permute.xlu1 %1352 }
  0xd3   : > { %v3286_v47 = vpop.permute.xlu0 %1284 }
  0xd6   : > { %2754 = vset.pattern.permute.xlu1 %v2867_v26  ;;  %v3297_v49 = vpop.permute.xlu1 %1356 }
  0xd7   : > { %1528 = vperm.xlu1 %2754, %v3090_v16   ;;  %v3300_v50 = vpop.permute.xlu0 %1288  ;;  %v2191_v16 = vld [vmem:[%s3293_s14 + $0x14] sm:$0xf] }
  0xd8   : > { %2221 = vperm.xlu0 %2761, %v2191_v16  }
  0xdb   : > { %2756 = vset.pattern.permute.xlu1 %v2863_v15  ;;  %v3303_v51 = vpop.permute.xlu1 %1124 }
  0xdc   : > { %1296 = vperm.xlu1 %2756, %v3192_v28   ;;  %v954_v52 = vpop.permute.xlu0 %953 }
  0xe0   : > { %1300 = vperm.xlu1 %2756, %v3170_v25   ;;  %v3307_v53 = vpop.permute.xlu1 %1432  ;;  %v959_v54 = vpop.permute.xlu0 %958 }
  0xe4   : > { %2757 = vset.pattern.permute.xlu1 %v2864_v19  ;;  %v3310_v55 = vpop.permute.xlu0 %963 }
  0xe5   : > { %1380 = vperm.xlu1 %2757, %v3170_v25   ;;  %v3313_v56 = vpop.permute.xlu1 %1200 }
  0xe8   : > { %v3315_v58 = vpop.permute.xlu0 %988 }
  0xe9   : > { %2758 = vset.pattern.permute.xlu1 %v2866_v21  ;;  %v3318_v59 = vpop.permute.xlu1 %1204  ;;  %v3361_v21 = vsub.s32 5, %v992_v60 }
  0xea   : > { %1456 = vperm.xlu1 %2758, %v3192_v28  }
  0xed   : > { %v1113_v61 = vpop.permute.xlu0 %1112 }
  0xee   : > { %2760 = vset.pattern.permute.xlu1 %v2867_v26  ;;  %v3323_v63 = vpop.permute.xlu1 %1516 }
  0xef   : > { %1536 = vperm.xlu1 %2760, %v3192_v28   ;;  %v2193_v28 = vld [vmem:[%s3293_s14 + $0x1c] sm:$0xf] }
  0xf0   : > { %v428_v5 = vpop.f32.mrf.mxu0  ;;  %v501_v6 = vpop.f32.mrf.mxu1  ;;  %2231 = vperm.xlu0 %2761, %v2193_v28  }
  0xf1   : > { %v3337_v7 = vpop.permute.xlu0 %1120  ;;  %v3340_v8 = vadd.f32 %v3328_v0, %v428_v5  ;;  %v3343_v9 = vadd.f32 %v3328_v0, %v501_v6  ;;  %v3378_v5 = vsub.s32 6, %v992_v60 }
  0xf2   : > { %v2490_v10 = vpop.f32.mrf.mxu0  ;;  %v2501_v11 = vpop.f32.mrf.mxu1 }
  0xf3   : > { %1540 = vperm.xlu1 %2760, %v3170_v25   ;;  %v3346_v12 = vpop.permute.xlu1 %1280  ;;  %v998_v13 = vrot.slane %v3343_v9, %v3331_v2  ;;  %v1070_v14 = vrot.slane %v3343_v9, %v3333_v3  ;;  %v1150_v15 = vrot.slane %v3343_v9, %v3335_v4  ;;  %v994_v24 = vrot.slane %v3340_v8, %v3331_v2  ;;  %v2187_v25 = vld [vmem:[%s3293_s14 + $0x4] sm:$0xf] }
  0xf4   : > { %v1230_v27 = vrot.slane %v3343_v9, %v3355_v17  ;;  %v1066_v62 = vrot.slane %v3340_v8, %v3333_v3  ;;  %v1310_v6 = vrot.slane %v3343_v9, %v3357_v18  ;;  %v1470_v16 = vrot.slane %v3343_v9, %v3378_v5 }
  0xf5   : > { %v3359_v19 = vpop.permute.xlu0 %1140  ;;  %v1024_v22 = vmul.f32 %v998_v13, %v959_v54  ;;  %v1096_v23 = vmul.f32 %v1070_v14, %v3245_v34  ;;  %v1176_v26 = vmul.f32 %v1150_v15, %v3250_v35  ;;  %v1023_v57 = vmul.f32 %v994_v24, %v954_v52  ;;  %v2188_v14 = vld [vmem:[%s3293_s14 + $0x8] sm:$0xf] }
  0xf6   : > { %v1146_v54 = vrot.slane %v3340_v8, %v3335_v4  ;;  %v3380_v35 = vsub.s32 7, %v992_v60  ;;  %v1390_v52 = vrot.slane %v3343_v9, %v3361_v21  ;;  %v1095_v11 = vmul.f32 %v1066_v62, %v3241_v33  ;;  %v2190_v62 = vld [vmem:[%s3293_s14 + $0x10] sm:$0xf] }
  0xf7   : > { %v1104_v48 = vmax.f32 %v1024_v22, %v1096_v23  ;;  %2762 = vset.pattern.permute.xlu1 %v2865_v20  ;;  %v1226_v15 = vrot.slane %v3340_v8, %v3355_v17  ;;  %v1336_v23 = vmul.f32 %v1310_v6, %v3266_v40 }
  0xf8   : > { %v3376_v34 = vpop.permute.xlu1 %973  ;;  %2201 = vperm.xlu1 %2762, %v2187_v25   ;;  %v1175_v13 = vmul.f32 %v1146_v54, %v1113_v61  ;;  %v1103_v22 = vmax.f32 %v1023_v57, %v1095_v11  ;;  %v1550_v24 = vrot.slane %v3343_v9, %v3380_v35  ;;  %v1306_v61 = vrot.slane %v3340_v8, %v3357_v18 }
  0xf9   : > { %v1184_v10 = vmax.f32 %v1104_v48, %v1176_v26  ;;  %v1416_v28 = vmul.f32 %v1390_v52, %v3297_v49  ;;  %v1255_v6 = vmul.f32 %v1226_v15, %v3254_v36  ;;  %v1386_v11 = vrot.slane %v3340_v8, %v3361_v21 }
  0xfa   : > { %v1197_v20 = vpop.permute.xlu0 %1196  ;;  %v1183_v57 = vmax.f32 %v1103_v22, %v1175_v13  ;;  %v1466_v49 = vrot.slane %v3340_v8, %v3378_v5  ;;  %v1496_v52 = vmul.f32 %v1470_v16, %v3275_v43  ;;  %v1335_v22 = vmul.f32 %v1306_v61, %v3259_v38 }
  0xfb   : > { %v1256_v60 = vmul.f32 %v1230_v27, %v1197_v20 }
  0xfc   : > { %v3395_v25 = vpop.permute.xlu1 %978  ;;  %v574_v33 = vpop.f32.mrf.mxu0  ;;  %2206 = vperm.xlu1 %2762, %v2188_v14   ;;  %v1263_v15 = vmax.f32 %v1183_v57, %v1255_v6  ;;  %v1495_v57 = vmul.f32 %v1466_v49, %v3307_v53 }
  0xfd   : > { %v1264_v26 = vmax.f32 %v1184_v10, %v1256_v60  ;;  %v3401_v27 = vadd.f32 %v3328_v0, %v574_v33  ;;  %v647_v48 = vpop.f32.mrf.mxu1  ;;  %v1576_v60 = vmul.f32 %v1550_v24, %v3323_v63  ;;  %v1415_v24 = vmul.f32 %v1386_v11, %v3284_v46 }
  0xfe   : > { %v3404_v40 = vpop.permute.xlu0 %1212  ;;  %v3407_v9 = vadd.f32 %v3328_v0, %v647_v48  ;;  %v2512_v54 = vpop.f32.mrf.mxu0  ;;  %v2192_v48 = vld [vmem:[%s3293_s14 + $0x18] sm:$0xf]  ;;  %v1343_v63 = vmax.f32 %v1263_v15, %v1335_v22  ;;  %s2868_s14 = smov [#allocation5]  }
  0xff   : > { %v1344_v10 = vmax.f32 %v1264_v26, %v1336_v23  ;;  %v1002_v13 = vrot.slane %v3401_v27, %v3331_v2  ;;  %v1074_v14 = vrot.slane %v3401_v27, %v3333_v3  ;;  %v2523_v20 = vpop.f32.mrf.mxu1  ;;  %v1154_v36 = vrot.slane %v3401_v27, %v3335_v4  ;;  %s2793_s21 = sshll.u32 %s2868_s14, 4  ;;  %s2794_s21 = int_to_ptr.vmem [resolvable:$false] %s2793_s21 }
 0x100   : > { %2216 = vperm.xlu1 %2762, %v2190_v62   ;;  %v1546_v26 = vrot.slane %v3340_v8, %v3380_v35  ;;  %v1006_v38 = vrot.slane %v3407_v9, %v3331_v2  ;;  %v1158_v8 = vrot.slane %v3407_v9, %v3335_v4  ;;  %v1314_v46 = vrot.slane %v3401_v27, %v3357_v18  ;;  %s2795_s22 = scalar_lea.vmem %s2794_s21, 1024  ;;  %p2796_p11 = scmp.lt.s32.totalorder %s3731_s23, %s2794_s21 }
 0x101   : > { %v1424_v33 = vmax.f32 %v1344_v10, %v1416_v28  ;;  %v3423_v23 = vpop.permute.xlu1 %1052  ;;  %v1025_v43 = vmul.f32 %v1002_v13, %v3310_v55  ;;  %v1097_v16 = vmul.f32 %v1074_v14, %v3278_v44  ;;  %v1234_v55 = vrot.slane %v3401_v27, %v3355_v17  ;;  %p2797_p12 = scmp.lt.s32.totalorder %s2795_s22, %s2789_s13 }
 0x102   : > { %v3430_v54 = vpop.permute.xlu0 %1216  ;;  %v1078_v44 = vrot.slane %v3407_v9, %v3333_v3  ;;  %v1177_v28 = vmul.f32 %v1154_v36, %v3337_v7  ;;  %v1423_v62 = vmax.f32 %v1343_v63, %v1415_v24  ;;  %v1026_v53 = vmul.f32 %v1006_v38, %v3272_v42 }
 0x103   : > { %v1504_v61 = vmax.f32 %v1424_v33, %v1496_v52  ;;  %v1105_v11 = vmax.f32 %v1025_v43, %v1097_v16  ;;  %v1238_v10 = vrot.slane %v3407_v9, %v3355_v17  ;;  %v1318_v7 = vrot.slane %v3407_v9, %v3357_v18  ;;  %p2798_p13 = por %p2797_p12, %p2796_p11 }
 0x104   : > { %2226 = vperm.xlu1 %2762, %v2192_v48   ;;  %v1098_v49 = vmul.f32 %v1078_v44, %v3257_v37  ;;  %v1503_v13 = vmax.f32 %v1423_v62, %v1495_v57  ;;  %v1178_v42 = vmul.f32 %v1158_v8, %v3303_v51  ;;  %v1257_v37 = vmul.f32 %v1234_v55, %v3313_v56 }
 0x105   : > { %v1584_v6 = vmax.f32 %v1504_v61, %v1576_v60  ;;  %v1398_v60 = vrot.slane %v3407_v9, %v3361_v21  ;;  %v1337_v36 = vmul.f32 %v1314_v46, %v3346_v12  ;;  %v1394_v15 = vrot.slane %v3401_v27, %v3361_v21  ;;  %p2799_p0 = pnand %p2798_p13, %p2792_p10 }
 0x106   : > { %v3449_v52 = vpop.permute.xlu1 %1360  ;;  %v1106_v20 = vmax.f32 %v1026_v53, %v1098_v49  ;;  %v1185_v43 = vmax.f32 %v1105_v11, %v1177_v28  ;;  %v1258_v63 = vmul.f32 %v1238_v10, %v3318_v59  ;;  %v1338_v24 = vmul.f32 %v1318_v7, %v3286_v47 }
 0x107   : > { %v1513_v14 = vpop.permute.xlu0 %1512  ;;  %2588 = vmatmul.mubr.msk.f32.vlgmr.msra.gmra.mxu1 %vm358_vm1, %v1584_v6  ;;  %v3481_v55 = vmul.f32 %v1398_v60, %v3269_v41  ;;  %v1474_v60 = vrot.slane %v3401_v27, %v3378_v5 }
 0x108   : > { %v1575_v22 = vmul.f32 %v1546_v26, %v1513_v14  ;;  %v720_v33 = vpop.f32.mrf.mxu0  ;;  %2602 = vmatpush3.msra.mxu1 %v3196_v29  ;;  %v1186_v51 = vmax.f32 %v1106_v20, %v1178_v42  ;;  %2609 = vmatprep.mubr.msk.f32.mxu1 %vm2860_vm0, %v2859_v1  ;;  %v1265_v62 = vmax.f32 %v1185_v43, %v1257_v37 }
 0x109   : > { %v3463_v16 = vadd.f32 %v3328_v0, %v720_v33  ;;  %v793_v48 = vpop.f32.mrf.mxu1  ;;  %2603 = vmatprep.subr.mxu1 %v2859_v1 }
 0x10a   : > { %v1583_v56 = vmax.f32 %v1503_v13, %v1575_v22  ;;  %v3468_v12 = vadd.f32 %v3328_v0, %v793_v48  ;;  %2604 = vmatpush3.msra.mxu1 %v3202_v30  ;;  %v2534_v26 = vpop.f32.mrf.mxu0  ;;  %v1266_v28 = vmax.f32 %v1186_v51, %v1258_v63  ;;  %v1345_v37 = vmax.f32 %v1265_v62, %v1337_v36 }
 0x10b   : > { %v1129_v57 = vpop.permute.xlu1 %1128  ;;  %v1010_v38 = vrot.slane %v3463_v16, %v3331_v2  ;;  %v1082_v59 = vrot.slane %v3463_v16, %v3333_v3  ;;  %v1162_v61 = vrot.slane %v3463_v16, %v3335_v4  ;;  %2605 = vmatprep.subr.mxu1 %v2859_v1  ;;  %v2545_v46 = vpop.f32.mrf.mxu1  ;;  %v1242_v13 = vrot.slane %v3463_v16, %v3355_v17 }
 0x10c   : > { %2577 = vmatmul.mubr.msk.f32.vlgmr.msra.gmra.mxu0 %vm358_vm1, %v1583_v56  ;;  %v1014_v47 = vrot.slane %v3468_v12, %v3331_v2  ;;  %v1086_v44 = vrot.slane %v3468_v12, %v3333_v3  ;;  %v1166_v8 = vrot.slane %v3468_v12, %v3335_v4  ;;  %v1566_v6 = vrot.slane %v3468_v12, %v3380_v35  ;;  %v3519_v48 = vpop.permute.xlu0 %1532 }
 0x10d   : > { %v1027_v53 = vmul.f32 %v1010_v38, %v3376_v34  ;;  %v1099_v41 = vmul.f32 %v1082_v59, %v3263_v39  ;;  %2591 = vmatpush3.msra.mxu0 %v3196_v29  ;;  %v3498_v10 = vmax.f32 %v1266_v28, %v1338_v24  ;;  %v1179_v34 = vmul.f32 %v1162_v61, %v1129_v57 }
 0x10e   : > { %v1028_v11 = vmul.f32 %v1014_v47, %v3395_v25  ;;  %v1100_v49 = vmul.f32 %v1086_v44, %v3423_v23  ;;  %2592 = vmatprep.subr.mxu0 %v2859_v1  ;;  %v1322_v39 = vrot.slane %v3463_v16, %v3357_v18  ;;  %v1402_v20 = vrot.slane %v3463_v16, %v3361_v21 }
 0x10f   : > { %v1107_v7 = vmax.f32 %v1027_v53, %v1099_v41  ;;  %v1133_v14 = vpop.permute.xlu1 %1132  ;;  %2593 = vmatpush3.msra.mxu0 %v3202_v30  ;;  %v1426_v42 = vmax.f32 %v3498_v10, %v3481_v55  ;;  %2598 = vmatprep.mubr.msk.f32.mxu0 %vm2860_vm0, %v2859_v1  ;;  %v1246_v51 = vrot.slane %v3468_v12, %v3355_v17 }
 0x110   : > { %v1108_v25 = vmax.f32 %v1028_v11, %v1100_v49  ;;  %v1180_v23 = vmul.f32 %v1166_v8, %v1133_v14  ;;  %2594 = vmatprep.subr.mxu0 %v2859_v1  ;;  %v1339_v33 = vmul.f32 %v1322_v39, %v3300_v50  ;;  %2606 = vmatpush3.msra.mxu1 %v3208_v31  ;;  %v1369_v44 = vpop.permute.xlu0 %1368 }
 0x111   : > { %v1187_v22 = vmax.f32 %v1107_v7, %v1179_v34  ;;  %2595 = vmatpush3.msra.mxu0 %v3208_v31  ;;  %v1326_v36 = vrot.slane %v3468_v12, %v3357_v18  ;;  %2607 = vmatprep.subr.mxu1 %v2859_v1  ;;  %v1406_v50 = vrot.slane %v3468_v12, %v3361_v21 }
 0x112   : > { %v3517_v43 = vmax.f32 %v1108_v25, %v1180_v23  ;;  %2596 = vmatprep.subr.mxu0 %v2859_v1  ;;  %v1482_v63 = vrot.slane %v3463_v16, %v3378_v5  ;;  %v1486_v56 = vrot.slane %v3468_v12, %v3378_v5  ;;  %2608 = vmatpush3.msra.mxu1 %v3218_v32 }
 0x113   : > { %2597 = vmatpush3.msra.mxu0 %v3218_v32  ;;  %v3537_v26 = vmul.f32 %v1246_v51, %v3404_v40  ;;  %v1562_v57 = vrot.slane %v3463_v16, %v3380_v35  ;;  %v1417_v38 = vmul.f32 %v1394_v15, %v3449_v52  ;;  %2623 = vmatprep.subr.mxu1 %v2859_v1 }
 0x114   : > { %v1445_v24 = vpop.permute.xlu1 %1444  ;;  %2612 = vmatprep.subr.mxu0 %v2859_v1  ;;  %v1478_v40 = vrot.slane %v3407_v9, %v3378_v5  ;;  %v1497_v47 = vmul.f32 %v1474_v60, %v3280_v45  ;;  %v1554_v62 = vrot.slane %v3401_v27, %v3380_v35  ;;  %v1558_v52 = vrot.slane %v3407_v9, %v3380_v35 }
 0x115   : > { %v1268_v59 = vmax.f32 %v3517_v43, %v3537_v26  ;;  %v1425_v61 = vmax.f32 %v1345_v37, %v1417_v38  ;;  %v3559_v11 = vmul.f32 %v1402_v20, %v1369_v44 }
 0x116   : > { %v1498_v41 = vmul.f32 %v1478_v40, %v1445_v24 }
 0x117   : > { %v1505_v49 = vmax.f32 %v1425_v61, %v1497_v47 }
 0x119   : > { %v1209_v8 = vpop.permute.xlu1 %1208  ;;  %v866_v28 = vpop.f32.mrf.mxu0 }
 0x11a   : > { %v1259_v46 = vmul.f32 %v1242_v13, %v1209_v8  ;;  %v3557_v15 = vadd.f32 %v3328_v0, %v866_v28  ;;  %v939_v53 = vpop.f32.mrf.mxu1 }
 0x11b   : > { %v3562_v45 = vadd.f32 %v3328_v0, %v939_v53  ;;  %v2556_v7 = vpop.f32.mrf.mxu0 }
 0x11c   : > { %v1267_v34 = vmax.f32 %v1187_v22, %v1259_v46  ;;  %v1018_v13 = vrot.slane %v3557_v15, %v3331_v2  ;;  %v1090_v27 = vrot.slane %v3557_v15, %v3333_v3  ;;  %v1170_v9 = vrot.slane %v3557_v15, %v3335_v4  ;;  %v2567_v14 = vpop.f32.mrf.mxu1 }
 0x11d   : > { %v1022_v39 = vrot.slane %v3562_v45, %v3331_v2  ;;  %v1094_v20 = vrot.slane %v3562_v45, %v3333_v3  ;;  %v1174_v0 = vrot.slane %v3562_v45, %v3335_v4  ;;  %v1254_v25 = vrot.slane %v3562_v45, %v3355_v17 }
 0x11e   : > { %v3578_v23 = vmax.f32 %v1267_v34, %v1339_v33  ;;  %v1521_v60 = vpop.permute.xlu1 %1520  ;;  %v1250_v37 = vrot.slane %v3557_v15, %v3355_v17  ;;  %v1330_v22 = vrot.slane %v3557_v15, %v3357_v18  ;;  %v1410_v2 = vrot.slane %v3557_v15, %v3361_v21 }
 0x11f   : > { %v1577_v43 = vmul.f32 %v1554_v62, %v1521_v60  ;;  %v1030_v3 = vmul.f32 %v1022_v39, %v3315_v58  ;;  %v1182_v51 = vmul.f32 %v1174_v0, %v3359_v19  ;;  %v1334_v24 = vrot.slane %v3562_v45, %v3357_v18 }
 0x120   : > { %v1427_v33 = vmax.f32 %v3578_v23, %v3559_v11  ;;  %v3593_v26 = vmul.f32 %v1250_v37, %v3430_v54  ;;  %v1414_v38 = vrot.slane %v3562_v45, %v3361_v21  ;;  %v1494_v40 = vrot.slane %v3562_v45, %v3378_v5 }
 0x121   : > { %v1585_v61 = vmax.f32 %v1505_v49, %v1577_v43  ;;  %v1490_v58 = vrot.slane %v3557_v15, %v3378_v5  ;;  %v1570_v19 = vrot.slane %v3557_v15, %v3380_v35  ;;  %v1574_v44 = vrot.slane %v3562_v45, %v3380_v35  ;;  %v2385_v5 = vld [vmem:[%s3783_s6] ss:$0 sm:$0xff] }
 0x122   : > { %v1525_v47 = vpop.permute.xlu1 %1524  ;;  %v1506_v54 = vmax.f32 %v1426_v42, %v1498_v41 }
 0x123   : > { %v1578_v8 = vmul.f32 %v1558_v52, %v1525_v47  ;;  %2599 = vmatmul.mubr.msk.f32.vlgmr.msra.gmra.mxu0 %vm358_vm1, %v1585_v61 }
 0x124   : > { %2613 = vmatpush3.msra.mxu0 %v3196_v29  ;;  %2620 = vmatprep.mubr.msk.f32.mxu0 %vm2860_vm0, %v2859_v1 }
 0x125   : > { %v1586_v28 = vmax.f32 %v1506_v54, %v1578_v8  ;;  %2614 = vmatprep.subr.mxu0 %v2859_v1 }
 0x126   : > { %2615 = vmatpush3.msra.mxu0 %v3202_v30 }
 0x127   : > { %v1293_v46 = vpop.permute.xlu1 %1292  ;;  %2610 = vmatmul.mubr.msk.f32.vlgmr.msra.gmra.mxu1 %vm358_vm1, %v1586_v28  ;;  %2616 = vmatprep.subr.mxu0 %v2859_v1 }
 0x128   : > { %v1340_v55 = vmul.f32 %v1326_v36, %v1293_v46  ;;  %2624 = vmatpush3.msra.mxu1 %v3196_v29  ;;  %2631 = vmatprep.mubr.msk.f32.mxu1 %vm2860_vm0, %v2859_v1 }
 0x129   : > { %2625 = vmatprep.subr.mxu1 %v2859_v1  ;;  %2617 = vmatpush3.msra.mxu0 %v3208_v31 }
 0x12a   : > { %v1348_v10 = vmax.f32 %v1268_v59, %v1340_v55  ;;  %2626 = vmatpush3.msra.mxu1 %v3202_v30  ;;  %2618 = vmatprep.subr.mxu0 %v2859_v1 }
 0x12b   : > { %2627 = vmatprep.subr.mxu1 %v2859_v1  ;;  %2619 = vmatpush3.msra.mxu0 %v3218_v32 }
 0x12c   : > { %v984_v42 = vpop.permute.xlu1 %983  ;;  %2628 = vmatpush3.msra.mxu1 %v3208_v31  ;;  %2634 = vmatprep.subr.mxu0 %v2859_v1 }
 0x12d   : > { %2629 = vmatprep.subr.mxu1 %v2859_v1  ;;  %v1029_v59 = vmul.f32 %v1018_v13, %v984_v42 }
 0x12e   : > { %2630 = vmatpush3.msra.mxu1 %v3218_v32 }
 0x12f   : > { %2645 = vmatprep.subr.mxu1 %v2859_v1 }
 0x131   : > { %v1057_v36 = vpop.permute.xlu1 %1056 }
 0x132   : > { %v1101_v62 = vmul.f32 %v1090_v27, %v1057_v36 }
 0x134   : > { %v1109_v52 = vmax.f32 %v1029_v59, %v1101_v62 }
 0x135   : > { %v1061_v53 = vpop.permute.xlu1 %1060 }
 0x136   : > { %v1102_v41 = vmul.f32 %v1094_v20, %v1061_v53 }
 0x138   : > { %v1110_v11 = vmax.f32 %v1030_v3, %v1102_v41 }
 0x13a   : > { %v1373_v49 = vpop.permute.xlu1 %1372  ;;  %v1190_v7 = vmax.f32 %v1110_v11, %v1182_v51 }
 0x13b   : > { %v1420_v34 = vmul.f32 %v1406_v50, %v1373_v49  ;;  %v1580_v50 = vmul.f32 %v1566_v6, %v3519_v48  ;;  %v1377_v48 = vpop.permute.xlu0 %1376 }
 0x13c   : > { %v1421_v16 = vmul.f32 %v1410_v2, %v1377_v48 }
 0x13d   : > { %v1428_v14 = vmax.f32 %v1348_v10, %v1420_v34 }
 0x13f   : > { %v1137_v39 = vpop.permute.xlu1 %1136  ;;  %v1461_v2 = vpop.permute.xlu0 %1460 }
 0x140   : > { %v1181_v0 = vmul.f32 %v1170_v9, %v1137_v39  ;;  %v1502_v47 = vmul.f32 %v1494_v40, %v1461_v2 }
 0x142   : > { %v1189_v23 = vmax.f32 %v1109_v52, %v1181_v0 }
 0x143   : > { %v2197_v45 = vpop.permute.xlu0 %2196 }
 0x144   : > { %v1449_v60 = vpop.permute.xlu1 %1448  ;;  %v1269_v13 = vmax.f32 %v1189_v23, %v3593_v26 }
 0x145   : > { %v1499_v27 = vmul.f32 %v1482_v63, %v1449_v60 }
 0x147   : > { %v1507_v20 = vmax.f32 %v1427_v33, %v1499_v27  ;;  %v2212_v11 = vpop.permute.xlu0 %2211 }
 0x148   : > { %v1453_v37 = vpop.permute.xlu1 %1452 }
 0x149   : > { %v1500_v4 = vmul.f32 %v1486_v56, %v1453_v37 }
 0x14b   : > { %v1508_v9 = vmax.f32 %v1428_v14, %v1500_v4 }
 0x14d   : > { %v1588_v43 = vmax.f32 %v1508_v9, %v1580_v50  ;;  %v1221_v3 = vpop.permute.xlu1 %1220 }
 0x14e   : > { %v1262_v51 = vmul.f32 %v1254_v25, %v1221_v3 }
 0x14f   : > { %2632 = vmatmul.mubr.msk.f32.vlgmr.msra.gmra.mxu1 %vm358_vm1, %v1588_v43 }
 0x150   : > { %v1270_v63 = vmax.f32 %v1190_v7, %v1262_v51  ;;  %2646 = vmatpush3.msra.mxu1 %v3196_v29  ;;  %2653 = vmatprep.mubr.msk.f32.mxu1 %vm2860_vm0, %v2859_v1 }
 0x151   : > { %2647 = vmatprep.subr.mxu1 %v2859_v1 }
 0x152   : > { %v1529_v6 = vpop.permute.xlu1 %1528  ;;  %2648 = vmatpush3.msra.mxu1 %v3202_v30 }
 0x153   : > { %v1579_v12 = vmul.f32 %v1562_v57, %v1529_v6  ;;  %2649 = vmatprep.subr.mxu1 %v2859_v1  ;;  %v2222_v39 = vpop.permute.xlu0 %2221 }
 0x154   : > { %2650 = vmatpush3.msra.mxu1 %v3208_v31 }
 0x155   : > { %v1587_v17 = vmax.f32 %v1507_v20, %v1579_v12  ;;  %2651 = vmatprep.subr.mxu1 %v2859_v1 }
 0x156   : > { %2652 = vmatpush3.msra.mxu1 %v3218_v32 }
 0x157   : > { %v1297_v56 = vpop.permute.xlu1 %1296  ;;  %2621 = vmatmul.mubr.msk.f32.vlgmr.msra.gmra.mxu0 %vm358_vm1, %v1587_v17 }
 0x158   : > { %v1341_v25 = vmul.f32 %v1330_v22, %v1297_v56  ;;  %2635 = vmatpush3.msra.mxu0 %v3196_v29  ;;  %2642 = vmatprep.mubr.msk.f32.mxu0 %vm2860_vm0, %v2859_v1 }
 0x159   : > { %2636 = vmatprep.subr.mxu0 %v2859_v1 }
 0x15a   : > { %v1349_v57 = vmax.f32 %v1269_v13, %v1341_v25  ;;  %2637 = vmatpush3.msra.mxu0 %v3202_v30 }
 0x15b   : > { %v1301_v33 = vpop.permute.xlu1 %1300  ;;  %2638 = vmatprep.subr.mxu0 %v2859_v1 }
 0x15c   : > { %v1429_v26 = vmax.f32 %v1349_v57, %v1421_v16  ;;  %v1342_v22 = vmul.f32 %v1334_v24, %v1301_v33  ;;  %2639 = vmatpush3.msra.mxu0 %v3208_v31 }
 0x15d   : > { %2640 = vmatprep.subr.mxu0 %v2859_v1 }
 0x15e   : > { %v1350_v29 = vmax.f32 %v1270_v63, %v1342_v22  ;;  %2641 = vmatpush3.msra.mxu0 %v3218_v32 }
 0x160   : > { %v1381_v61 = vpop.permute.xlu1 %1380 }
 0x161   : > { %v1422_v30 = vmul.f32 %v1414_v38, %v1381_v61 }
 0x163   : > { %v1430_v18 = vmax.f32 %v1350_v29, %v1422_v30 }
 0x165   : > { %v1510_v24 = vmax.f32 %v1430_v18, %v1502_v47  ;;  %v1457_v31 = vpop.permute.xlu1 %1456 }
 0x166   : > { %v1501_v1 = vmul.f32 %v1490_v58, %v1457_v31 }
 0x168   : > { %v1509_v54 = vmax.f32 %v1429_v26, %v1501_v1 }
 0x16a   : > { %v1537_v32 = vpop.permute.xlu1 %1536 }
 0x16b   : > { %v1581_v21 = vmul.f32 %v1570_v19, %v1537_v32  ;;  %v2232_v12 = vpop.permute.xlu0 %2231 }
 0x16d   : > { %v1589_v8 = vmax.f32 %v1509_v54, %v1581_v21 }
 0x16e   : > { %v1541_v38 = vpop.permute.xlu1 %1540 }
 0x16f   : > { %v1582_v40 = vmul.f32 %v1574_v44, %v1541_v38  ;;  %2643 = vmatmul.mubr.msk.f32.vlgmr.msra.gmra.mxu0 %vm358_vm1, %v1589_v8 }
 0x171   : > { %v1590_v28 = vmax.f32 %v1510_v24, %v1582_v40 }
 0x173   : > { %2654 = vmatmul.mubr.msk.f32.vlgmr.msra.gmra.mxu1 %vm358_vm1, %v1590_v28  ;;  %v2202_v58 = vpop.permute.xlu1 %2201 }
 0x177   : > { %v2207_v59 = vpop.permute.xlu1 %2206 }
 0x17b   : > { %v2217_v27 = vpop.permute.xlu1 %2216 }
 0x17f   : > { %v2227_v43 = vpop.permute.xlu1 %2226 }
 0x1c7   : > { %v1744_v15 = vpop.f32.mrf.mxu1 }
 0x1c8   : > { %v1745_v19 = vadd.f32 %v2385_v5, %v1744_v15 }
 0x1c9   : > { %v2589_v46 = vpop.f32.mrf.mxu1 }
 0x1ca   : > { %v2235_v55 = vmul.f32 %v2202_v58, %v1745_v19 }
 0x1cc   : > { %v1671_v35 = vpop.f32.mrf.mxu0  ;;  %2244 = vst.msk [vmem:[%s3708_s19 + $0x4] sm:$0xf] %vm2242_vm2, %v2235_v55 }
 0x1cd   : > { %v1672_v44 = vadd.f32 %v2385_v5, %v1671_v35 }
 0x1ce   : > { %v2578_v10 = vpop.f32.mrf.mxu0 }
 0x1cf   : > { %v2234_v42 = vmul.f32 %v2197_v45, %v1672_v44 }
 0x1d1   : > { %2243 = vst.msk [vmem:[%s3708_s19] sm:$0xf] %vm2242_vm2, %v2234_v42 }
 0x1e3   : > { %v1817_v36 = vpop.f32.mrf.mxu0 }
 0x1e4   : > { %v1818_v62 = vadd.f32 %v2385_v5, %v1817_v36 }
 0x1e5   : > { %v2600_v52 = vpop.f32.mrf.mxu0 }
 0x1e6   : > { %v2236_v53 = vmul.f32 %v2207_v59, %v1818_v62 }
 0x1e7   : > { %v1890_v41 = vpop.f32.mrf.mxu1 }
 0x1e8   : > { %2245 = vst.msk [vmem:[%s3708_s19 + $0x8] sm:$0xf] %vm2242_vm2, %v2236_v53  ;;  %v1891_v49 = vadd.f32 %v2385_v5, %v1890_v41 }
 0x1e9   : > { %v2611_v7 = vpop.f32.mrf.mxu1 }
 0x1ea   : > { %v2237_v34 = vmul.f32 %v2212_v11, %v1891_v49 }
 0x1ec   : > { %2246 = vst.msk [vmem:[%s3708_s19 + $0xc] sm:$0xf] %vm2242_vm2, %v2237_v34 }
 0x20f   : > { %v2036_v14 = vpop.f32.mrf.mxu1 }
 0x210   : > { %v2037_v0 = vadd.f32 %v2385_v5, %v2036_v14 }
 0x211   : > { %v2633_v23 = vpop.f32.mrf.mxu1 }
 0x212   : > { %v2239_v60 = vmul.f32 %v2222_v39, %v2037_v0 }
 0x214   : > { %2248 = vst.msk [vmem:[%s3708_s19 + $0x14] sm:$0xf] %vm2242_vm2, %v2239_v60 }
 0x217   : > { %v1963_v13 = vpop.f32.mrf.mxu0 }
 0x218   : > { %v1964_v20 = vadd.f32 %v2385_v5, %v1963_v13 }
 0x219   : > { %v2622_v37 = vpop.f32.mrf.mxu0 }
 0x21a   : > { %v2238_v50 = vmul.f32 %v2217_v27, %v1964_v20 }
 0x21c   : > { %2247 = vst.msk [vmem:[%s3708_s19 + $0x10] sm:$0xf] %vm2242_vm2, %v2238_v50 }
 0x22f   : > { %v2109_v4 = vpop.f32.mrf.mxu0 }
 0x230   : > { %v2110_v9 = vadd.f32 %v2385_v5, %v2109_v4 }
 0x231   : > { %v2644_v3 = vpop.f32.mrf.mxu0 }
 0x232   : > { %v2240_v51 = vmul.f32 %v2227_v43, %v2110_v9 }
 0x233   : > { %v2182_v63 = vpop.f32.mrf.mxu1 }
 0x234   : > { %2249 = vst.msk [vmem:[%s3708_s19 + $0x18] sm:$0xf] %vm2242_vm2, %v2240_v51  ;;  %v2183_v6 = vadd.f32 %v2385_v5, %v2182_v63 }
 0x235   : > { %v2655_v17 = vpop.f32.mrf.mxu1 }
 0x236   : > { %v2241_v48 = vmul.f32 %v2232_v12, %v2183_v6 }
 0x238   : > { %2250 = vst.msk [vmem:[%s3708_s19 + $0x1c] sm:$0xf] %vm2242_vm2, %v2241_v48 }
 0x239   : > { %2802 = shalt.err (!%p2799_p0)
}
 0x23a   : > { %s2803_s15 = scalar_lea.hbm %s3729_s8, 512  ;;  %s2807_s18 = scalar_lea.hbm %s3784_s7, 1024 }
 0x23b   : > { %p2804_p1 = scmp.ne.s32.totalorder %s3729_s8, %s2803_s15  ;;  %p2808_p4 = scmp.lt.s32.totalorder %s3729_s8, %s3784_s7 }
 0x23c   : > { %p2809_p7 = scmp.lt.s32.totalorder %s2807_s18, %s2803_s15 }
 0x23d   : > { %p2805_p2 = pnand %p2804_p1, %p2949_p5 }
 0x23e   : > { %p2810_p6 = por %p2809_p7, %p2808_p4 }
 0x23f   : > { %p2806_p3 = pneg %p2805_p2 }
 0x241   : > { %p2811_p8 = pnand %p2810_p6, %p2806_p3 }
 0x243   : > { %2814 = shalt.err (!%p2811_p8)
}
 0x244   : > { %s2869_s29 = smov 64   ;;  %s2870_s9 = smov 4  }
 0x245   : > { %2660 = dma.vmem_to_hbm [thread:$0]  (%p2949_p5), %s3731_s23, 512, %s3729_s8, %s3737_s28, %s2869_s29, %s2869_s29, %s2870_s9  }
 0x246 PF: > { %p2672_p9 = scmp.ge.s32.totalorder %s2853_s27, 2  ;;  %s2280_s13 = sand.u32 1, %s2841_s24  }
 0x247   : > { %p3788_p10 = scmp.ne.s32.totalorder %s3786_s12, 0  ;;  %s2281_s14 = scalar_lea.sflag [#allocation4], %s2280_s13 }
 0x249   : > { %p2667_p11 = pnand %p2672_p9, %p3788_p10 }
 0x24b   : > { %p2668_p12 = pneg %p2667_p11 }
 0x24d   : > { %2836 = dma.done.wait (%p2668_p12), %s2281_s14, 512  }
 0x24e   : > { %2838 = vsyncadd (%p2668_p12), %s2281_s14, 4294966784  ;;  %p18_p13 = scmp.ge.s32.totalorder %s2936_s30, 4   ;;  %s3789_s24 = smov %s2845_s25 }
 0x24f   : > { %s3790_s25 = smov %s2849_s26  ;;  %s3791_s26 = smov %s2947_s10 }
 0x250   : > { %s3792_s27 = smov %s2936_s30  ;;  %20 = sbr.rel (!%p18_p13) target bundleno = 4 (0x4), region = 94 }
 0x255   :  { %2286 = vsyncpa [#allocation3], 1 }
 0x256   :  { %2288 = vsyncpa [#allocation3 + $0x1], 1 }
 0x257   :  { %2289 = vsyncpa [#allocation4], 1 }
 0x258   :  { %2291 = vsyncpa [#allocation4 + $0x1], 1 }

</bundles_post_ra>
